<compile_context>
chip_gen: v6e
topology: v6e:2x2x1
jax: 0.10.0
libtpu: 0.0.40
codegen_flags: <defaults>
</compile_context>

<pallas_src>
import jax
import jax.numpy as jnp
from jax import lax
from jax.experimental import pallas as pl
from jax.experimental.pallas import tpu as pltpu


def gather_scale_kernel(feat_ref, idx_ref, w_ref, out_ref):
    # feat_ref: VMEM (B, N, D)      -- contiguous slab of B edges' source feats
    # idx_ref : VMEM (B, K, 1) i32  -- per-edge gather indices into the N axis
    # w_ref   : VMEM (B, K, 1) f32  -- per-gathered-row edge weights
    # out_ref : VMEM (B, K, D)      -- gathered + scaled messages for this block
    B, N, _ = feat_ref.shape
    K = out_ref.shape[1]

    # One-hot selection matrix over the N axis, with the edge weight folded in,
    # so a single batched MXU matmul does gather + scale.
    n_iota = lax.broadcasted_iota(jnp.int32, (B, K, N), dimension=2)
    sel = (idx_ref[...] == n_iota).astype(feat_ref.dtype) * w_ref[...]  # (B,K,N)

    out_ref[...] = jnp.einsum(
        "bkn,bnd->bkd",
        sel,
        feat_ref[...],
        precision=lax.Precision.HIGHEST,          # keep full f32 semantics
        preferred_element_type=jnp.float32,
    ).astype(out_ref.dtype)


def _pick_block_edges(E, N, D, K, itemsize=4,
                      target_slab_bytes=4 << 20,
                      vmem_budget_bytes=24 << 20):
    """Block size in edges: ~4 MiB feat slab per buffer, <= ~24 MiB total
    double-buffered working set (safe inside a 32 MiB scoped VMEM limit on
    every generation), and at least 2 grid steps so the pipeline / v7x's two
    TensorCores have work to overlap."""
    per_edge = (N * D + K * D + 2 * K) * itemsize       # feat + out + idx + w
    b_budget = max(1, vmem_budget_bytes // (2 * max(per_edge, 1)))
    b_slab = max(1, target_slab_bytes // max(N * D * itemsize, 1))
    B = max(1, min(E, b_budget, b_slab))
    if E >= 2 and pl.cdiv(E, B) < 2:
        B = pl.cdiv(E, 2)
    return int(B)


def message_func(feat_src, order_info, edge_weight, block_edges=None):
    """feat_src: (E, N, D), order_info: (E, K) int, edge_weight: (E*K, 1).
    Returns 'm' of shape (E*K, D) = gathered rows * edge_weight (row broadcast)."""
    E, N, D = feat_src.shape
    K = order_info.shape[1]
    itemsize = jnp.dtype(feat_src.dtype).itemsize
    B = block_edges if block_edges is not None else _pick_block_edges(
        E, N, D, K, itemsize)
    B = int(min(B, E))
    grid = (pl.cdiv(E, B),)

    # Glue (plain JAX, cheap): clamp indices (torch.index_select would reject
    # OOB; here we pin them in-range), shape indices/weights so they block
    # per-edge alongside the output tile with full-extent trailing dims.
    idx = jnp.clip(order_info.astype(jnp.int32), 0, N - 1).reshape(E, K, 1)
    w = edge_weight.reshape(E, K, 1).astype(feat_src.dtype)

    out = pl.pallas_call(
        gather_scale_kernel,
        out_shape=jax.ShapeDtypeStruct((E, K, D), feat_src.dtype),
        grid_spec=pltpu.PrefetchScalarGridSpec(
            num_scalar_prefetch=0,
            grid=grid,
            in_specs=[
                pl.BlockSpec((B, N, D), lambda i: (i, 0, 0)),   # feat slab
                pl.BlockSpec((B, K, 1), lambda i: (i, 0, 0)),   # indices
                pl.BlockSpec((B, K, 1), lambda i: (i, 0, 0)),   # weights
            ],
            out_specs=pl.BlockSpec((B, K, D), lambda i: (i, 0, 0)),
        ),
        compiler_params=pltpu.CompilerParams(
            dimension_semantics=("parallel",),    # independent edge blocks
            vmem_limit_bytes=32 << 20,            # safe on v7x, lifts v5e default
        ),
    )(feat_src, idx, w)

    return out.reshape(E * K, D)


if __name__ == "__main__":
    key = jax.random.PRNGKey(0)
    k1, k2, k3 = jax.random.split(key, 3)

    # edges, nodes-per-edge-view, hidden, gathered-per-edge
    E, N, D, K = 16, 16, 128, 8

    feat_src = jax.random.normal(k1, (E, N, D), dtype=jnp.float32)
    order_info = jax.random.randint(k2, (E, K), 0, N, dtype=jnp.int32)
    edge_weight = jax.random.uniform(k3, (E * K, 1), dtype=jnp.float32)

    m = message_func(feat_src, order_info, edge_weight)
    m = jax.block_until_ready(m)

    # Pure-JAX reference (mirrors torch.unbind + index_select + stack + view)
    gathered = feat_src[jnp.arange(E)[:, None], order_info]      # (E, K, D)
    ref = gathered.reshape(E * K, D) * edge_weight               # (E*K, D)

    assert m.shape == (E * K, D)
    assert jnp.allclose(m, ref, atol=1e-5, rtol=1e-5), "mismatch vs reference"
    print("KERNEL_OK")
</pallas_src>

<mosaic_0001>
module attributes {stable_mosaic.version = 11 : i64} {
  func.func @gather_scale_kernel(%arg0: i32, %arg1: memref<8x16x128xf32, #tpu.memory_space<vmem>>, %arg2: memref<8x8x1xi32, #tpu.memory_space<vmem>>, %arg3: memref<8x8x1xf32, #tpu.memory_space<vmem>>, %arg4: memref<8x8x128xf32, #tpu.memory_space<vmem>>) attributes {dimension_semantics = [#tpu.dimension_semantics<parallel>], iteration_bounds = array<i64: 2>, scalar_prefetch = 0 : i64, scratch_operands = 0 : i64, tpu.core_type = #tpu.core_type<tc>, window_params = [{transform_indices = @transform_0, window_bounds = array<i64: 8, 16, 128>}, {transform_indices = @transform_1, window_bounds = array<i64: 8, 8, 1>}, {transform_indices = @transform_2, window_bounds = array<i64: 8, 8, 1>}, {transform_indices = @transform_3, window_bounds = array<i64: 8, 8, 128>}]} {
    %0 = tpu.iota {dimensions = array<i32: 2>} : vector<8x8x16xi32>
    %c0 = arith.constant 0 : index
    %c0_0 = arith.constant 0 : index
    %c0_1 = arith.constant 0 : index
    %1 = vector.load %arg2[%c0, %c0_0, %c0_1] : memref<8x8x1xi32, #tpu.memory_space<vmem>>, vector<8x8x1xi32>
    %2 = vector.broadcast %1 : vector<8x8x1xi32> to vector<8x8x16xi32>
    %3 = arith.cmpi eq, %2, %0 : vector<8x8x16xi32>
    %4 = arith.extui %3 : vector<8x8x16xi1> to vector<8x8x16xi32>
    %5 = arith.sitofp %4 : vector<8x8x16xi32> to vector<8x8x16xf32>
    %c0_2 = arith.constant 0 : index
    %c0_3 = arith.constant 0 : index
    %c0_4 = arith.constant 0 : index
    %6 = vector.load %arg3[%c0_2, %c0_3, %c0_4] : memref<8x8x1xf32, #tpu.memory_space<vmem>>, vector<8x8x1xf32>
    %7 = vector.broadcast %6 : vector<8x8x1xf32> to vector<8x8x16xf32>
    %8 = arith.mulf %5, %7 : vector<8x8x16xf32>
    %c0_5 = arith.constant 0 : index
    %c0_6 = arith.constant 0 : index
    %c0_7 = arith.constant 0 : index
    %9 = vector.load %arg1[%c0_5, %c0_6, %c0_7] : memref<8x16x128xf32, #tpu.memory_space<vmem>>, vector<8x16x128xf32>
    "tpu.trace_start"() <{level = 10 : i32, message = "bkn,bnd->bkd"}> : () -> ()
    %cst = arith.constant dense<0.000000e+00> : vector<8x8x128xf32>
    %10 = tpu.matmul %8, %9, %cst {dimension_numbers = #tpu.dot_dimension_numbers<[2], [1], [1], [2], [0, 0, 0, 1, 1, 2], [0], [0]>, precision = #tpu.contract_precision<fp32>} : vector<8x8x16xf32>, vector<8x16x128xf32>, vector<8x8x128xf32> -> vector<8x8x128xf32>
    "tpu.trace_stop"() : () -> ()
    %c0_8 = arith.constant 0 : index
    %c0_9 = arith.constant 0 : index
    %c0_10 = arith.constant 0 : index
    %11 = vector.load %arg4[%c0_8, %c0_9, %c0_10] : memref<8x8x128xf32, #tpu.memory_space<vmem>>, vector<8x8x128xf32>
    tpu.vector_store %arg4[%c0_8, %c0_9, %c0_10], %10 {strides = array<i32>} : memref<8x8x128xf32, #tpu.memory_space<vmem>>, vector<8x8x128xf32>,
    return
  }
  func.func @transform_0(%arg0: i32) -> (i32, i32, i32) {
    %c0_i32 = arith.constant 0 : i32
    %c0_i32_0 = arith.constant 0 : i32
    %c0_i32_1 = arith.constant 0 : i32
    return %arg0, %c0_i32, %c0_i32_0 : i32, i32, i32
  }
  func.func @transform_1(%arg0: i32) -> (i32, i32, i32) {
    %c0_i32 = arith.constant 0 : i32
    %c0_i32_0 = arith.constant 0 : i32
    %c0_i32_1 = arith.constant 0 : i32
    return %arg0, %c0_i32, %c0_i32_0 : i32, i32, i32
  }
  func.func @transform_2(%arg0: i32) -> (i32, i32, i32) {
    %c0_i32 = arith.constant 0 : i32
    %c0_i32_0 = arith.constant 0 : i32
    %c0_i32_1 = arith.constant 0 : i32
    return %arg0, %c0_i32, %c0_i32_0 : i32, i32, i32
  }
  func.func @transform_3(%arg0: i32) -> (i32, i32, i32) {
    %c0_i32 = arith.constant 0 : i32
    %c0_i32_0 = arith.constant 0 : i32
    %c0_i32_1 = arith.constant 0 : i32
    return %arg0, %c0_i32, %c0_i32_0 : i32, i32, i32
  }
}

</mosaic_0001>

<bundles_post_ra>
// kernel: tpu_custom_call.1
= control target key start
LH: loop header
LB: loop body
LE: loop exit
PB: predicated region body
PF: predicated region fallthrough
CT: control target
= control target key end

     0   :  { %8 = vsyncpa [#allocation3], 0  ;;  %s5493_s0 = inlined_call_operand.vmem [shape: f32[16,16,128], index: 0, kind: input, shape index: {}]   ;;  %s5494_s1 = inlined_call_operand.vmem [shape: s32[16,8,1], index: 1, kind: input, shape index: {}]   ;;  %s5495_s2 = inlined_call_operand.vmem [shape: f32[16,8,1], index: 2, kind: input, shape index: {}]   ;;  %s5496_s3 = inlined_call_operand.hbm [shape: f32[16,8,128], index: 3, kind: output, shape index: {}]  }
   0x1   :  { %10 = vsyncpa [#allocation3 + $0x1], 0  ;;  %s4795_s12 = smov 0   ;;  %s4797_s13 = smov 0  }
   0x2   :  { %s4799_s14 = smov 0   ;;  %s4801_s15 = smov 0  }
   0x3 LB: > { %s4816_s16 = sadd.s32 4294967295, %s4767_s15   ;;  %s4154_s17 = sadd.s32 4294967294, %s4767_s15   ;;  %s4767_s15 = sphi %s4801_s15, %s5502_s15   ;;  %s4763_s14 = sphi %s4799_s14, %s5501_s14   ;;  %s4759_s13 = sphi %s4797_s13, %s5500_s13   ;;  %s4755_s12 = sphi %s4795_s12, %s5499_s12  }
   0x4   : > { %s4820_s18 = sadd.s32 1, %s4767_s15   ;;  %s101_s19 = sadd.s32 1, %s4763_s14 }
   0x5   : > { %s98_s20 = ssub.s32 %s4767_s15, %s4820_s18  ;;  %p111_p0 = scmp.ne.s32.totalorder %s4763_s14, %s4759_s13 }
   0x6   : > { %p99_p1 = scmp.eq.s32.totalorder %s98_s20, 0  ;;  %p112_p2 = scmp.eq.s32.totalorder %s4816_s16, 1 }
   0x7   : > { %p117_p3 = scmp.ne.s32.totalorder %s4759_s13, %s4755_s12  ;;  %p118_p4 = scmp.eq.s32.totalorder %s4154_s17, 1 }
   0x8   : > { %s4831_s21 = scalar_select %p99_p1, %s4763_s14, %s101_s19  }
   0x9   : > { %p4833_p5 = por %p112_p2, %p111_p0  ;;  %p4837_p6 = por %p118_p4, %p117_p3 }
   0xa   : > { %p4157_p7 = scmp.ge.s32.totalorder %s4767_s15, 1  ;;  %p164_p8 = scmp.lt.s32.totalorder %s4767_s15, 3 }
   0xc   : > { %p165_p9 = pnand %p4157_p7, %p164_p8 }
   0xd   : > { %s4159_s24 = sshll.u32 (!%p165_p9), %s4816_s16, 3  ;;  %s196_s9 = sand.u32 (!%p165_p9), 1, %s4759_s13  }
   0xe   : > { %168 = sbr.rel (%p165_p9) target bundleno = 509 (0x1fd), region = 32  ;;  %p200_p10 = scmp.lt.s32.totalorder (!%p165_p9), %s4159_s24, 15 }
   0xf   : > { %s4158_s10 = sshll.u32 (!%p165_p9), %s196_s9, 6  ;;  %s4180_s17 = sshll.u32 (!%p165_p9), %s4816_s16, 10 }
  0x10   : > { %s5432_s11 = scalar_lea.vmem (!%p165_p9), [#allocation2], %s4158_s10  ;;  %s5453_s26 = scalar_lea.sflag (!%p165_p9), [#allocation3], %s196_s9 }
  0x11   : > { %s4068_s19 = sshll.u32 (!%p165_p9), %s5432_s11, 4  ;;  %s4772_s27 = smov (!%p165_p9), [#allocation2]   ;;  %s5448_s19 = int_to_ptr.vmem [resolvable:$true] %s4068_s19 }
  0x12   : > { %s4707_s16 = scalar_lea.vmem (!%p165_p9), %s5448_s19, 1024 }
  0x13   : > { %v4769_v0 = vmov 0   ;;  %s5504_s24 = smov (!%p200_p10, %s4159_s24), 15  ;;  %v4770_v1 = vmov 0.0   ;;  %vm4771_vm0 = vmmov 0   ;;  %v219_v30 = vlaneseq  ;;  %p4708_p11 = scmp.ne.s32.totalorder %s5448_s19, %s4707_s16 }
  0x14   : > { %4706 = vset.pattern.permute.xlu1 %v4769_v0  ;;  %4705 = vset.pattern.permute.xlu0 %v4769_v0  ;;  %s4163_s25 = sshll.u32 %s5504_s24, 3  ;;  %s4179_s29 = sshll.u32 %s5504_s24, 4  ;;  %vm349_vm2 = vcmask 130048  }
  0x15   : > { %4332 = vmatprep.subr.mxu1 %v4770_v1  ;;  %4325 = vmatprep.subr.mxu0 %v4770_v1  ;;  %s4849_s28 = scalar_lea.vmem %s5494_s1, %s4163_s25  ;;  %s4856_s5 = scalar_lea.vmem %s5495_s2, %s4163_s25  ;;  %v4907_v31 = vand.u32 127, %v219_v30 }
  0x16   : > { %v222_v2 = vld [vmem:[%s4849_s28 + $0x8] sm:$0xff]  ;;  %v221_v3 = vld [vmem:[%s4849_s28] sm:$0xff]  ;;  %s4861_s8 = scalar_lea.vmem %s5493_s0, %s4179_s29  ;;  %v279_v8 = vld [vmem:[%s4856_s5 + $0x10] sm:$0xff]  ;;  %4336 = vmatprep.mubr.msk.f32.mxu1 %vm4771_vm0, %v4770_v1  ;;  %4329 = vmatprep.mubr.msk.f32.mxu0 %vm4771_vm0, %v4770_v1  ;;  %s5446_s25 = scalar_lea.hbm %s5496_s3, %s4180_s17 }
  0x17   : > { %233 = vperm.xlu1 %4706, %v222_v2   ;;  %230 = vperm.xlu0 %4705, %v221_v3   ;;  %v278_v4 = vld [vmem:[%s4856_s5 + $0x8] sm:$0xff]  ;;  %v277_v5 = vld [vmem:[%s4856_s5] sm:$0xff]  ;;  %v223_v9 = vld [vmem:[%s4849_s28 + $0x10] sm:$0xff]  ;;  %p4709_p12 = pnand %p4708_p11, %p4833_p5 }
  0x18   : > { %v334_v6 = vld [vmem:[%s4861_s8 + $0x8] sm:$0xff]  ;;  %v333_v7 = vld [vmem:[%s4861_s8] sm:$0xff]  ;;  %v280_v14 = vld [vmem:[%s4856_s5 + $0x18] sm:$0xff] }
  0x19   : > { %v4869_v10 = vand.u32 4294901760, %v334_v6  ;;  %v4871_v11 = vand.u32 4294901760, %v333_v7  ;;  %v224_v15 = vld [vmem:[%s4849_s28 + $0x18] sm:$0xff]  ;;  %v281_v20 = vld [vmem:[%s4856_s5 + $0x20] sm:$0xff]  ;;  %v282_v24 = vld [vmem:[%s4856_s5 + $0x28] sm:$0xff]  ;;  %p4710_p13 = pneg %p4709_p12 }
  0x1a   : > { %v225_v21 = vld [vmem:[%s4849_s28 + $0x20] sm:$0xff]  ;;  %v226_v25 = vld [vmem:[%s4849_s28 + $0x28] sm:$0xff]  ;;  %v283_v26 = vld [vmem:[%s4856_s5 + $0x30] sm:$0xff] }
  0x1b   : > { %292 = vperm.xlu1 %4706, %v278_v4   ;;  %287 = vperm.xlu0 %4705, %v277_v5   ;;  %v4878_v12 = vsub.f32 %v334_v6, %v4869_v10  ;;  %v4881_v13 = vsub.f32 %v333_v7, %v4871_v11  ;;  %v227_v27 = vld [vmem:[%s4849_s28 + $0x30] sm:$0xff]  ;;  %v284_v28 = vld [vmem:[%s4856_s5 + $0x38] sm:$0xff]  ;;  %v338_v60 = vld [vmem:[%s4861_s8 + $0x28] sm:$0xff] }
  0x1c   : > { %4326 = vmatpush3.msra.mxu0 %v4869_v10  ;;  %v228_v29 = vld [vmem:[%s4849_s28 + $0x38] sm:$0xff]  ;;  %v335_v36 = vld [vmem:[%s4861_s8 + $0x10] sm:$0xff]  ;;  %v4964_v4 = vand.u32 4294901760, %v338_v60  ;;  %v337_v5 = vld [vmem:[%s4861_s8 + $0x20] sm:$0xff]  ;;  %s4711_s28 = sshll.u32 %s4772_s27, 4  ;;  %s4712_s28 = int_to_ptr.vmem [resolvable:$false] %s4711_s28 }
  0x1d   : > { %v461_v16 = vand.u32 4294901760, %v4878_v12  ;;  %v468_v17 = vand.u32 4294901760, %v4881_v13  ;;  %4327 = vmatprep.subr.mxu0 %v4770_v1  ;;  %v336_v32 = vld [vmem:[%s4861_s8 + $0x18] sm:$0xff]  ;;  %v4914_v37 = vand.u32 4294901760, %v335_v36  ;;  %s4713_s29 = scalar_lea.vmem %s4712_s28, 2048  ;;  %p4714_p0 = scmp.lt.s32.totalorder %s5448_s19, %s4712_s28 }
  0x1e   : > { %4328 = vmatpush3.msra.mxu0 %v4871_v11  ;;  %v4910_v35 = vand.u32 4294901760, %v336_v32  ;;  %p4715_p1 = scmp.lt.s32.totalorder %s4713_s29, %s4707_s16 }
  0x1f   : > { %297 = vperm.xlu1 %4706, %v279_v8   ;;  %236 = vperm.xlu0 %4705, %v223_v9   ;;  %v462_v18 = vsub.f32 %v4878_v12, %v461_v16  ;;  %v469_v19 = vsub.f32 %v4881_v13, %v468_v17  ;;  %v4923_v44 = vsub.f32 %v335_v36, %v4914_v37 }
  0x20   : > { %4339 = vmatprep.subr.mxu0 %v4770_v1  ;;  %v4918_v41 = vsub.f32 %v336_v32, %v4910_v35  ;;  %p4716_p2 = por %p4715_p1, %p4714_p0 }
  0x21   : > { %v463_v22 = vand.u32 4294901760, %v462_v18  ;;  %v470_v23 = vand.u32 4294901760, %v469_v19  ;;  %v930_v52 = vand.u32 4294901760, %v4923_v44  ;;  %v4986_v18 = vsub.f32 %v338_v60, %v4964_v4 }
  0x22   : > { %v923_v49 = vand.u32 4294901760, %v4918_v41  ;;  %p4717_p3 = pnand %p4716_p2, %p4710_p13 }
  0x23   : > { %302 = vperm.xlu1 %4706, %v280_v14   ;;  %239 = vperm.xlu0 %4705, %v224_v15   ;;  %v931_v59 = vsub.f32 %v4923_v44, %v930_v52 }
  0x24   : > { %4333 = vmatpush3.msra.mxu1 %v463_v22  ;;  %v924_v56 = vsub.f32 %v4918_v41, %v923_v49 }
  0x25   : > { %4334 = vmatprep.subr.mxu1 %v4770_v1  ;;  %v932_v7 = vand.u32 4294901760, %v931_v59 }
  0x26   : > { %4335 = vmatpush3.msra.mxu1 %v470_v23  ;;  %v925_v0 = vand.u32 4294901760, %v924_v56 }
  0x27   : > { %307 = vperm.xlu1 %4706, %v281_v20   ;;  %242 = vperm.xlu0 %4705, %v225_v21  }
  0x28   : > { %4346 = vmatprep.subr.mxu1 %v4770_v1 }
  0x2b   : > { %312 = vperm.xlu1 %4706, %v282_v24   ;;  %245 = vperm.xlu0 %4705, %v226_v25  }
  0x2f   : > { %317 = vperm.xlu1 %4706, %v283_v26   ;;  %248 = vperm.xlu0 %4705, %v227_v27  }
  0x33   : > { %322 = vperm.xlu1 %4706, %v284_v28   ;;  %251 = vperm.xlu0 %4705, %v228_v29  }
  0x92   : > { %v234_v33 = vpop.permute.xlu1 %233  ;;  %v231_v34 = vpop.permute.xlu0 %230 }
  0x93   : > { %vm253_vm1 = vcmp.eq.s32.totalorder %v231_v34, %v4907_v31  ;;  %vm254_vm3 = vcmp.eq.s32.totalorder %v234_v33, %v4907_v31 }
  0x94   : > { %v4166_v39 = vsel %vm253_vm1, 1.0, %v4770_v1  ;;  %v4167_v45 = vsel %vm254_vm3, 1.0, %v4770_v1 }
  0x96   : > { %v293_v38 = vpop.permute.xlu1 %292  ;;  %v288_v40 = vpop.permute.xlu0 %287 }
  0x97   : > { %v325_v42 = vmul.f32 %v4166_v39, %v288_v40  ;;  %v326_v51 = vmul.f32 %v4167_v45, %v293_v38  ;;  %v340_v40 = vld [vmem:[%s4861_s8 + $0x38] sm:$0xff] }
  0x98   : > { %v5053_v45 = vand.u32 4294901760, %v340_v40 }
  0x99   : > { %v351_v43 = vsel %vm349_vm2, %v325_v42, 0  ;;  %v813_v58 = vsel %vm349_vm2, %v326_v51, 0 }
  0x9a   : > { %v4926_v46 = vand.u32 4294901760, %v351_v43  ;;  %v4928_v47 = vpop.permute.xlu1 %297  ;;  %v4930_v48 = vpop.permute.xlu0 %236  ;;  %v4960_v2 = vand.u32 4294901760, %v813_v58 }
  0x9b   : > { %vm255_vm6 = vcmp.eq.s32.totalorder %v4930_v48, %v4907_v31 }
  0x9c   : > { %v421_v50 = vsub.f32 %v351_v43, %v4926_v46  ;;  %4337 = vmatmul.mubr.f32.vlgmr.msra.gmra.mxu1 %v4926_v46  ;;  %v4979_v14 = vsub.f32 %v813_v58, %v4960_v2  ;;  %v4168_v24 = vsel %vm255_vm6, 1.0, %v4770_v1 }
  0x9d   : > { %4347 = vmatpush3.msra.mxu1 %v4869_v10  ;;  %4350 = vmatprep.mubr.msk.f32.mxu1 %vm4771_vm0, %v4770_v1  ;;  %v327_v28 = vmul.f32 %v4168_v24, %v4928_v47 }
  0x9e   : > { %v4939_v53 = vpop.permute.xlu1 %302  ;;  %v4941_v54 = vpop.permute.xlu0 %239  ;;  %4348 = vmatprep.subr.mxu1 %v4770_v1  ;;  %v422_v55 = vand.u32 4294901760, %v421_v50  ;;  %v884_v26 = vand.u32 4294901760, %v4979_v14 }
  0x9f   : > { %4349 = vmatpush3.msra.mxu1 %v4871_v11  ;;  %v1275_v36 = vsel %vm349_vm2, %v327_v28, 0  ;;  %vm256_vm9 = vcmp.eq.s32.totalorder %v4941_v54, %v4907_v31 }
  0xa0   : > { %4351 = vmatmul.mubr.f32.vlgmr.msra.gmra.mxu1 %v422_v55  ;;  %4360 = vmatprep.subr.mxu1 %v4770_v1  ;;  %v423_v57 = vsub.f32 %v421_v50, %v422_v55  ;;  %v885_v32 = vsub.f32 %v4979_v14, %v884_v26  ;;  %v5050_v43 = vand.u32 4294901760, %v1275_v36  ;;  %v4169_v55 = vsel %vm256_vm9, 1.0, %v4770_v1 }
  0xa1   : > { %4361 = vmatpush3.msra.mxu1 %v4869_v10  ;;  %4364 = vmatprep.mubr.msk.f32.mxu1 %vm4771_vm0, %v4770_v1 }
  0xa2   : > { %v308_v61 = vpop.permute.xlu1 %307  ;;  %v243_v62 = vpop.permute.xlu0 %242  ;;  %4362 = vmatprep.subr.mxu1 %v4770_v1  ;;  %v424_v63 = vand.u32 4294901760, %v423_v57  ;;  %v5064_v48 = vsub.f32 %v1275_v36, %v5050_v43  ;;  %v342_v57 = vld [vmem:[%s4861_s8 + $0x48] sm:$0xff] }
  0xa3   : > { %vm257_vm4 = vcmp.eq.s32.totalorder %v243_v62, %v4907_v31  ;;  %4363 = vmatpush3.msra.mxu1 %v4871_v11  ;;  %v4976_v11 = vand.u32 4294901760, %v337_v5  ;;  %v341_v62 = vld [vmem:[%s4861_s8 + $0x40] sm:$0xff] }
  0xa4   : > { %v4170_v3 = vsel %vm257_vm4, 1.0, %v4770_v1  ;;  %4330 = vmatmul.mubr.f32.vlgmr.msra.gmra.mxu0 %v424_v63  ;;  %4365 = vmatmul.mubr.f32.vlgmr.msra.gmra.mxu1 %v4926_v46 }
  0xa5   : > { %v329_v6 = vmul.f32 %v4170_v3, %v308_v61  ;;  %4340 = vmatpush3.msra.mxu0 %v4878_v12  ;;  %4374 = vmatprep.subr.mxu1 %v4770_v1  ;;  %v5001_v23 = vsub.f32 %v337_v5, %v4976_v11  ;;  %v1385_v12 = vand.u32 4294901760, %v4986_v18  ;;  %v5125_v61 = vand.u32 4294901760, %v342_v57 }
  0xa6   : > { %4341 = vmatprep.subr.mxu0 %v4770_v1  ;;  %4375 = vmatpush3.msra.mxu1 %v925_v0  ;;  %v313_v8 = vpop.permute.xlu1 %312  ;;  %v246_v9 = vpop.permute.xlu0 %245  ;;  %v5133_v0 = vand.u32 4294901760, %v341_v62 }
  0xa7   : > { %v4971_v10 = vsel %vm349_vm2, %v329_v6, 0  ;;  %vm258_vm5 = vcmp.eq.s32.totalorder %v246_v9, %v4907_v31  ;;  %4342 = vmatpush3.msra.mxu0 %v4881_v13  ;;  %4376 = vmatprep.subr.mxu1 %v4770_v1  ;;  %v1392_v13 = vand.u32 4294901760, %v5001_v23  ;;  %v1386_v33 = vsub.f32 %v4986_v18, %v1385_v12 }
  0xa8   : > { %v4171_v15 = vsel %vm258_vm5, 1.0, %v4770_v1  ;;  %4343 = vmatprep.mubr.msk.f32.mxu0 %vm4771_vm0, %v4770_v1  ;;  %4353 = vmatprep.subr.mxu0 %v4770_v1  ;;  %v5140_v3 = vsub.f32 %v342_v57, %v5125_v61 }
  0xa9   : > { %v330_v19 = vmul.f32 %v4171_v15, %v313_v8  ;;  %4377 = vmatpush3.msra.mxu1 %v932_v7  ;;  %4378 = vmatprep.mubr.msk.f32.mxu1 %vm4771_vm0, %v4770_v1  ;;  %v1393_v39 = vsub.f32 %v5001_v23, %v1392_v13  ;;  %v1387_v42 = vand.u32 4294901760, %v1386_v33 }
  0xaa   : > { %4344 = vmatmul.mubr.f32.vlgmr.msra.gmra.mxu0 %v421_v50  ;;  %4379 = vmatmul.mubr.f32.vlgmr.msra.gmra.mxu1 %v4960_v2  ;;  %v318_v20 = vpop.permute.xlu1 %317  ;;  %v249_v21 = vpop.permute.xlu0 %248  ;;  %v5070_v50 = vsub.f32 %v340_v40, %v5053_v45  ;;  %v2309_v6 = vand.u32 4294901760, %v5140_v3 }
  0xab   : > { %v4994_v22 = vsel %vm349_vm2, %v330_v19, 0  ;;  %4354 = vmatpush3.msra.mxu0 %v461_v16  ;;  %4388 = vmatprep.subr.mxu1 %v4770_v1  ;;  %vm259_vm7 = vcmp.eq.s32.totalorder %v249_v21, %v4907_v31  ;;  %v1394_v47 = vand.u32 4294901760, %v1393_v39  ;;  %v5186_v19 = vand.u32 4294901760, %v4971_v10  ;;  %v343_v21 = vld [vmem:[%s4861_s8 + $0x50] sm:$0xff]  ;;  %v345_v39 = vld [vmem:[%s4861_s8 + $0x60] sm:$0xff] }
  0xac   : > { %4355 = vmatprep.subr.mxu0 %v4770_v1  ;;  %4389 = vmatpush3.msra.mxu1 %v4910_v35  ;;  %v4172_v25 = vsel %vm259_vm7, 1.0, %v4770_v1  ;;  %v1847_v54 = vand.u32 4294901760, %v5070_v50  ;;  %v2310_v9 = vsub.f32 %v5140_v3, %v2309_v6  ;;  %v5197_v24 = vand.u32 4294901760, %v343_v21 }
  0xad   : > { %v331_v16 = vmul.f32 %v4172_v25, %v318_v20  ;;  %4356 = vmatpush3.msra.mxu0 %v468_v17  ;;  %4390 = vmatprep.subr.mxu1 %v4770_v1  ;;  %v2269_v25 = vsub.f32 %v4971_v10, %v5186_v19 }
  0xae   : > { %4357 = vmatprep.mubr.msk.f32.mxu0 %vm4771_vm0, %v4770_v1  ;;  %4367 = vmatprep.subr.mxu0 %v4770_v1  ;;  %v252_v27 = vpop.permute.xlu0 %251  ;;  %v323_v17 = vpop.permute.xlu1 %322  ;;  %v5214_v10 = vsub.f32 %v343_v21, %v5197_v24 }
  0xaf   : > { %v5017_v29 = vsel %vm349_vm2, %v331_v16, 0  ;;  %4391 = vmatpush3.msra.mxu1 %v4914_v37  ;;  %4392 = vmatprep.mubr.msk.f32.mxu1 %vm4771_vm0, %v4770_v1  ;;  %vm260_vm8 = vcmp.eq.s32.totalorder %v252_v27, %v4907_v31  ;;  %v1346_v31 = vand.u32 4294901760, %v5064_v48 }
  0xb0   : > { %4358 = vmatmul.mubr.f32.vlgmr.msra.gmra.mxu0 %v4926_v46  ;;  %4393 = vmatmul.mubr.f32.vlgmr.msra.gmra.mxu1 %v884_v26  ;;  %v4173_v30 = vsel %vm260_vm8, 1.0, %v4770_v1  ;;  %v339_v46 = vld [vmem:[%s4861_s8 + $0x30] sm:$0xff]  ;;  %v2778_v27 = vand.u32 4294901760, %v5214_v10 }
  0xb1   : > { %4368 = vmatpush3.msra.mxu0 %v4910_v35  ;;  %4402 = vmatprep.subr.mxu1 %v4770_v1  ;;  %v332_v34 = vmul.f32 %v4173_v30, %v323_v17  ;;  %v346_v30 = vld [vmem:[%s4861_s8 + $0x68] sm:$0xff] }
  0xb2   : > { %4369 = vmatprep.subr.mxu0 %v4770_v1  ;;  %4403 = vmatpush3.msra.mxu1 %v4910_v35  ;;  %v886_v35 = vand.u32 4294901760, %v885_v32  ;;  %v2779_v17 = vsub.f32 %v5214_v10, %v2778_v27  ;;  %v5253_v36 = vand.u32 4294901760, %v346_v30 }
  0xb3   : > { %v5036_v38 = vsel %vm349_vm2, %v332_v34, 0  ;;  %4370 = vmatpush3.msra.mxu0 %v4914_v37  ;;  %4404 = vmatprep.subr.mxu1 %v4770_v1  ;;  %v5250_v34 = vand.u32 4294901760, %v4994_v22 }
  0xb4   : > { %4371 = vmatprep.mubr.msk.f32.mxu0 %vm4771_vm0, %v4770_v1  ;;  %4381 = vmatprep.subr.mxu0 %v4770_v1  ;;  %v2780_v40 = vand.u32 4294901760, %v2779_v17 }
  0xb5   : > { %4405 = vmatpush3.msra.mxu1 %v4914_v37  ;;  %4406 = vmatprep.mubr.msk.f32.mxu1 %vm4771_vm0, %v4770_v1  ;;  %v5061_v37 = vand.u32 4294901760, %v339_v46 }
  0xb6   : > { %4372 = vmatmul.mubr.f32.vlgmr.msra.gmra.mxu0 %v886_v35  ;;  %4407 = vmatmul.mubr.f32.vlgmr.msra.gmra.mxu1 %v4960_v2  ;;  %v5261_v35 = vand.u32 4294901760, %v345_v39 }
  0xb7   : > { %4382 = vmatpush3.msra.mxu0 %v4918_v41  ;;  %4416 = vmatprep.subr.mxu1 %v4770_v1  ;;  %v5082_v51 = vsub.f32 %v339_v46, %v5061_v37  ;;  %v328_v41 = vmul.f32 %v4169_v55, %v4939_v53 }
  0xb8   : > { %4383 = vmatprep.subr.mxu0 %v4770_v1  ;;  %4417 = vmatpush3.msra.mxu1 %v1387_v42  ;;  %v2731_v42 = vsub.f32 %v4994_v22, %v5250_v34  ;;  %v5278_v22 = vsub.f32 %v345_v39, %v5261_v35 }
  0xb9   : > { %4384 = vmatpush3.msra.mxu0 %v4923_v44  ;;  %4418 = vmatprep.subr.mxu1 %v4770_v1  ;;  %v1347_v44 = vsub.f32 %v5064_v48, %v1346_v31  ;;  %v1737_v53 = vsel %vm349_vm2, %v328_v41, 0 }
  0xba   : > { %4385 = vmatprep.mubr.msk.f32.mxu0 %vm4771_vm0, %v4770_v1  ;;  %4395 = vmatprep.subr.mxu0 %v4770_v1  ;;  %v5122_v60 = vand.u32 4294901760, %v1737_v53 }
  0xbb   : > { %4419 = vmatpush3.msra.mxu1 %v1394_v47  ;;  %4420 = vmatprep.mubr.msk.f32.mxu1 %vm4771_vm0, %v4770_v1  ;;  %v1348_v58 = vand.u32 4294901760, %v1347_v44  ;;  %v3240_v47 = vand.u32 4294901760, %v5278_v22 }
  0xbc   : > { %4386 = vmatmul.mubr.f32.vlgmr.msra.gmra.mxu0 %v4979_v14  ;;  %4421 = vmatmul.mubr.f32.vlgmr.msra.gmra.mxu1 %v5050_v43  ;;  %v344_v14 = vld [vmem:[%s4861_s8 + $0x58] sm:$0xff] }
  0xbd   : > { %4396 = vmatpush3.msra.mxu0 %v923_v49  ;;  %4430 = vmatprep.subr.mxu1 %v4770_v1  ;;  %v1854_v49 = vand.u32 4294901760, %v5082_v51  ;;  %v5189_v20 = vand.u32 4294901760, %v344_v14 }
  0xbe   : > { %4397 = vmatprep.subr.mxu0 %v4770_v1  ;;  %4431 = vmatpush3.msra.mxu1 %v4964_v4 }
  0xbf   : > { %4398 = vmatpush3.msra.mxu0 %v930_v52  ;;  %4432 = vmatprep.subr.mxu1 %v4770_v1  ;;  %v1848_v52 = vsub.f32 %v5070_v50, %v1847_v54  ;;  %v1855_v56 = vsub.f32 %v5082_v51, %v1854_v49  ;;  %v5205_v26 = vsub.f32 %v344_v14, %v5189_v20 }
  0xc0   : > { %4399 = vmatprep.mubr.msk.f32.mxu0 %vm4771_vm0, %v4770_v1  ;;  %4409 = vmatprep.subr.mxu0 %v4770_v1 }
  0xc1   : > { %4433 = vmatpush3.msra.mxu1 %v4976_v11  ;;  %4434 = vmatprep.mubr.msk.f32.mxu1 %vm4771_vm0, %v4770_v1  ;;  %v1849_v59 = vand.u32 4294901760, %v1848_v52  ;;  %v1856_v63 = vand.u32 4294901760, %v1855_v56  ;;  %v2771_v16 = vand.u32 4294901760, %v5205_v26 }
  0xc2   : > { %4400 = vmatmul.mubr.f32.vlgmr.msra.gmra.mxu0 %v4960_v2  ;;  %4435 = vmatmul.mubr.f32.vlgmr.msra.gmra.mxu1 %v1346_v31  ;;  %v1807_v2 = vsub.f32 %v1737_v53, %v5122_v60 }
  0xc3   : > { %4410 = vmatpush3.msra.mxu0 %v4964_v4  ;;  %4444 = vmatprep.subr.mxu1 %v4770_v1 }
  0xc4   : > { %4411 = vmatprep.subr.mxu0 %v4770_v1  ;;  %4445 = vmatpush3.msra.mxu1 %v4964_v4  ;;  %v5150_v4 = vsub.f32 %v341_v62, %v5133_v0  ;;  %v1808_v5 = vand.u32 4294901760, %v1807_v2 }
  0xc5   : > { %4412 = vmatpush3.msra.mxu0 %v4976_v11  ;;  %4446 = vmatprep.subr.mxu1 %v4770_v1 }
  0xc6   : > { %4413 = vmatprep.mubr.msk.f32.mxu0 %vm4771_vm0, %v4770_v1  ;;  %4423 = vmatprep.subr.mxu0 %v4770_v1  ;;  %v2316_v7 = vand.u32 4294901760, %v5150_v4  ;;  %v1809_v8 = vsub.f32 %v1807_v2, %v1808_v5 }
  0xc7   : > { %4447 = vmatpush3.msra.mxu1 %v4976_v11  ;;  %4448 = vmatprep.mubr.msk.f32.mxu1 %vm4771_vm0, %v4770_v1 }
  0xc8   : > { %4414 = vmatmul.mubr.f32.vlgmr.msra.gmra.mxu0 %v1348_v58  ;;  %4449 = vmatmul.mubr.f32.vlgmr.msra.gmra.mxu1 %v5050_v43  ;;  %v2317_v11 = vsub.f32 %v5150_v4, %v2316_v7  ;;  %v1810_v15 = vand.u32 4294901760, %v1809_v8 }
  0xc9   : > { %4424 = vmatpush3.msra.mxu0 %v4986_v18  ;;  %4458 = vmatprep.subr.mxu1 %v4770_v1  ;;  %v2311_v18 = vand.u32 4294901760, %v2310_v9 }
  0xca   : > { %4425 = vmatprep.subr.mxu0 %v4770_v1  ;;  %4459 = vmatpush3.msra.mxu1 %v1849_v59 }
  0xcb   : > { %4426 = vmatpush3.msra.mxu0 %v5001_v23  ;;  %4460 = vmatprep.subr.mxu1 %v4770_v1  ;;  %v2318_v23 = vand.u32 4294901760, %v2317_v11 }
  0xcc   : > { %4427 = vmatprep.mubr.msk.f32.mxu0 %vm4771_vm0, %v4770_v1  ;;  %4437 = vmatprep.subr.mxu0 %v4770_v1 }
  0xcd   : > { %4461 = vmatpush3.msra.mxu1 %v1856_v63  ;;  %4462 = vmatprep.mubr.msk.f32.mxu1 %vm4771_vm0, %v4770_v1 }
  0xce   : > { %4428 = vmatmul.mubr.f32.vlgmr.msra.gmra.mxu0 %v5064_v48  ;;  %4463 = vmatmul.mubr.f32.vlgmr.msra.gmra.mxu1 %v5122_v60 }
  0xcf   : > { %4438 = vmatpush3.msra.mxu0 %v1385_v12  ;;  %4472 = vmatprep.subr.mxu1 %v4770_v1  ;;  %v2270_v12 = vand.u32 4294901760, %v2269_v25 }
  0xd0   : > { %4439 = vmatprep.subr.mxu0 %v4770_v1  ;;  %4473 = vmatpush3.msra.mxu1 %v5053_v45 }
  0xd1   : > { %4440 = vmatpush3.msra.mxu0 %v1392_v13  ;;  %4474 = vmatprep.subr.mxu1 %v4770_v1  ;;  %v2271_v28 = vsub.f32 %v2269_v25, %v2270_v12  ;;  %v2772_v13 = vsub.f32 %v5205_v26, %v2771_v16 }
  0xd2   : > { %4441 = vmatprep.mubr.msk.f32.mxu0 %vm4771_vm0, %v4770_v1  ;;  %4451 = vmatprep.subr.mxu0 %v4770_v1 }
  0xd3   : > { %4475 = vmatpush3.msra.mxu1 %v5061_v37  ;;  %4476 = vmatprep.mubr.msk.f32.mxu1 %vm4771_vm0, %v4770_v1  ;;  %v2272_v32 = vand.u32 4294901760, %v2271_v28  ;;  %v2773_v33 = vand.u32 4294901760, %v2772_v13 }
  0xd4   : > { %4442 = vmatmul.mubr.f32.vlgmr.msra.gmra.mxu0 %v5050_v43  ;;  %4477 = vmatmul.mubr.f32.vlgmr.msra.gmra.mxu1 %v1808_v5  ;;  %v5269_v43 = vsub.f32 %v346_v30, %v5253_v36 }
  0xd5   : > { %4452 = vmatpush3.msra.mxu0 %v5053_v45  ;;  %4486 = vmatprep.subr.mxu1 %v4770_v1 }
  0xd6   : > { %4453 = vmatprep.subr.mxu0 %v4770_v1  ;;  %4487 = vmatpush3.msra.mxu1 %v5053_v45  ;;  %v2732_v45 = vand.u32 4294901760, %v2731_v42  ;;  %v3233_v46 = vand.u32 4294901760, %v5269_v43 }
  0xd7   : > { %4454 = vmatpush3.msra.mxu0 %v5061_v37  ;;  %4488 = vmatprep.subr.mxu1 %v4770_v1 }
  0xd8   : > { %4455 = vmatprep.mubr.msk.f32.mxu0 %vm4771_vm0, %v4770_v1  ;;  %4465 = vmatprep.subr.mxu0 %v4770_v1  ;;  %v3234_v48 = vsub.f32 %v5269_v43, %v3233_v46 }
  0xd9   : > { %4489 = vmatpush3.msra.mxu1 %v5061_v37  ;;  %4490 = vmatprep.mubr.msk.f32.mxu1 %vm4771_vm0, %v4770_v1  ;;  %v2733_v37 = vsub.f32 %v2731_v42, %v2732_v45 }
  0xda   : > { %4456 = vmatmul.mubr.f32.vlgmr.msra.gmra.mxu0 %v1810_v15  ;;  %4491 = vmatmul.mubr.f32.vlgmr.msra.gmra.mxu1 %v5122_v60  ;;  %v3235_v31 = vand.u32 4294901760, %v3234_v48 }
  0xdb   : > { %4466 = vmatpush3.msra.mxu0 %v5070_v50  ;;  %4500 = vmatprep.subr.mxu1 %v4770_v1  ;;  %v3241_v50 = vsub.f32 %v5278_v22, %v3240_v47  ;;  %v2734_v55 = vand.u32 4294901760, %v2733_v37 }
  0xdc   : > { %4467 = vmatprep.subr.mxu0 %v4770_v1  ;;  %4501 = vmatpush3.msra.mxu1 %v2311_v18 }
  0xdd   : > { %4468 = vmatpush3.msra.mxu0 %v5082_v51  ;;  %4502 = vmatprep.subr.mxu1 %v4770_v1  ;;  %v348_v51 = vld [vmem:[%s4861_s8 + $0x78] sm:$0xff]  ;;  %v3242_v44 = vand.u32 4294901760, %v3241_v50 }
  0xde   : > { %4469 = vmatprep.mubr.msk.f32.mxu0 %vm4771_vm0, %v4770_v1  ;;  %4479 = vmatprep.subr.mxu0 %v4770_v1  ;;  %v5317_v41 = vand.u32 4294901760, %v348_v51 }
  0xdf   : > { %4503 = vmatpush3.msra.mxu1 %v2318_v23  ;;  %4504 = vmatprep.mubr.msk.f32.mxu1 %vm4771_vm0, %v4770_v1 }
  0xe0   : > { %4470 = vmatmul.mubr.f32.vlgmr.msra.gmra.mxu0 %v1807_v2  ;;  %4505 = vmatmul.mubr.f32.vlgmr.msra.gmra.mxu1 %v5186_v19  ;;  %v5333_v56 = vsub.f32 %v348_v51, %v5317_v41  ;;  %v3654_v2 = vand.u32 4294901760, %v5036_v38 }
  0xe1   : > { %4480 = vmatpush3.msra.mxu0 %v1847_v54  ;;  %4514 = vmatprep.subr.mxu1 %v4770_v1  ;;  %v5314_v54 = vand.u32 4294901760, %v5017_v29 }
  0xe2   : > { %4481 = vmatprep.subr.mxu0 %v4770_v1  ;;  %4515 = vmatpush3.msra.mxu1 %v5125_v61  ;;  %v3695_v58 = vand.u32 4294901760, %v5333_v56 }
  0xe3   : > { %4482 = vmatpush3.msra.mxu0 %v1854_v49  ;;  %4516 = vmatprep.subr.mxu1 %v4770_v1  ;;  %v347_v49 = vld [vmem:[%s4861_s8 + $0x70] sm:$0xff]  ;;  %v3193_v53 = vsub.f32 %v5017_v29, %v5314_v54 }
  0xe4   : > { %4483 = vmatprep.mubr.msk.f32.mxu0 %vm4771_vm0, %v4770_v1  ;;  %4493 = vmatprep.subr.mxu0 %v4770_v1  ;;  %v5325_v52 = vand.u32 4294901760, %v347_v49 }
  0xe5   : > { %4517 = vmatpush3.msra.mxu1 %v5133_v0  ;;  %4518 = vmatprep.mubr.msk.f32.mxu1 %vm4771_vm0, %v4770_v1  ;;  %v3194_v57 = vand.u32 4294901760, %v3193_v53 }
  0xe6   : > { %4484 = vmatmul.mubr.f32.vlgmr.msra.gmra.mxu0 %v5122_v60  ;;  %4519 = vmatmul.mubr.f32.vlgmr.msra.gmra.mxu1 %v2270_v12  ;;  %v5342_v29 = vsub.f32 %v347_v49, %v5325_v52 }
  0xe7   : > { %4494 = vmatpush3.msra.mxu0 %v5125_v61  ;;  %4528 = vmatprep.subr.mxu1 %v4770_v1  ;;  %v3195_v60 = vsub.f32 %v3193_v53, %v3194_v57 }
  0xe8   : > { %4495 = vmatprep.subr.mxu0 %v4770_v1  ;;  %4529 = vmatpush3.msra.mxu1 %v5125_v61  ;;  %v3702_v59 = vand.u32 4294901760, %v5342_v29  ;;  %v3696_v61 = vsub.f32 %v5333_v56, %v3695_v58 }
  0xe9   : > { %4496 = vmatpush3.msra.mxu0 %v5133_v0  ;;  %4530 = vmatprep.subr.mxu1 %v4770_v1  ;;  %v3196_v63 = vand.u32 4294901760, %v3195_v60 }
  0xea   : > { %4497 = vmatprep.mubr.msk.f32.mxu0 %vm4771_vm0, %v4770_v1  ;;  %4507 = vmatprep.subr.mxu0 %v4770_v1  ;;  %v3703_v62 = vsub.f32 %v5342_v29, %v3702_v59 }
  0xeb   : > { %4531 = vmatpush3.msra.mxu1 %v5133_v0  ;;  %4532 = vmatprep.mubr.msk.f32.mxu1 %vm4771_vm0, %v4770_v1  ;;  %v3697_v0 = vand.u32 4294901760, %v3696_v61 }
  0xec   : > { %4498 = vmatmul.mubr.f32.vlgmr.msra.gmra.mxu0 %v2272_v32  ;;  %4533 = vmatmul.mubr.f32.vlgmr.msra.gmra.mxu1 %v5186_v19 }
  0xed   : > { %4508 = vmatpush3.msra.mxu0 %v5140_v3  ;;  %4542 = vmatprep.subr.mxu1 %v4770_v1  ;;  %v3704_v3 = vand.u32 4294901760, %v3703_v62 }
  0xee   : > { %4509 = vmatprep.subr.mxu0 %v4770_v1  ;;  %4543 = vmatpush3.msra.mxu1 %v2773_v33 }
  0xef   : > { %4510 = vmatpush3.msra.mxu0 %v5150_v4  ;;  %4544 = vmatprep.subr.mxu1 %v4770_v1  ;;  %v3655_v4 = vsub.f32 %v5036_v38, %v3654_v2 }
  0xf0   : > { %4511 = vmatprep.mubr.msk.f32.mxu0 %vm4771_vm0, %v4770_v1  ;;  %4521 = vmatprep.subr.mxu0 %v4770_v1 }
  0xf1   : > { %4545 = vmatpush3.msra.mxu1 %v2780_v40  ;;  %4546 = vmatprep.mubr.msk.f32.mxu1 %vm4771_vm0, %v4770_v1  ;;  %v3656_v38 = vand.u32 4294901760, %v3655_v4 }
  0xf2   : > { %4512 = vmatmul.mubr.f32.vlgmr.msra.gmra.mxu0 %v2269_v25  ;;  %4547 = vmatmul.mubr.f32.vlgmr.msra.gmra.mxu1 %v5250_v34 }
  0xf3   : > { %4522 = vmatpush3.msra.mxu0 %v2309_v6  ;;  %4556 = vmatprep.subr.mxu1 %v4770_v1  ;;  %v3657_v5 = vsub.f32 %v3655_v4, %v3656_v38 }
  0xf4   : > { %4523 = vmatprep.subr.mxu0 %v4770_v1  ;;  %4557 = vmatpush3.msra.mxu1 %v5189_v20 }
  0xf5   : > { %4524 = vmatpush3.msra.mxu0 %v2316_v7  ;;  %4558 = vmatprep.subr.mxu1 %v4770_v1  ;;  %v3658_v6 = vand.u32 4294901760, %v3657_v5 }
  0xf6   : > { %4525 = vmatprep.mubr.msk.f32.mxu0 %vm4771_vm0, %v4770_v1  ;;  %4535 = vmatprep.subr.mxu0 %v4770_v1 }
  0xf7   : > { %4559 = vmatpush3.msra.mxu1 %v5197_v24  ;;  %4560 = vmatprep.mubr.msk.f32.mxu1 %vm4771_vm0, %v4770_v1 }
  0xf8   : > { %4526 = vmatmul.mubr.f32.vlgmr.msra.gmra.mxu0 %v5186_v19  ;;  %4561 = vmatmul.mubr.f32.vlgmr.msra.gmra.mxu1 %v2732_v45 }
  0xf9   : > { %4536 = vmatpush3.msra.mxu0 %v5189_v20  ;;  %4570 = vmatprep.subr.mxu1 %v4770_v1 }
  0xfa   : > { %4537 = vmatprep.subr.mxu0 %v4770_v1  ;;  %4571 = vmatpush3.msra.mxu1 %v5189_v20 }
  0xfb   : > { %4538 = vmatpush3.msra.mxu0 %v5197_v24  ;;  %4572 = vmatprep.subr.mxu1 %v4770_v1 }
  0xfc   : > { %4539 = vmatprep.mubr.msk.f32.mxu0 %vm4771_vm0, %v4770_v1  ;;  %4549 = vmatprep.subr.mxu0 %v4770_v1 }
  0xfd   : > { %4573 = vmatpush3.msra.mxu1 %v5197_v24  ;;  %4574 = vmatprep.mubr.msk.f32.mxu1 %vm4771_vm0, %v4770_v1 }
  0xfe   : > { %4540 = vmatmul.mubr.f32.vlgmr.msra.gmra.mxu0 %v2734_v55  ;;  %4575 = vmatmul.mubr.f32.vlgmr.msra.gmra.mxu1 %v5250_v34 }
  0xff   : > { %4550 = vmatpush3.msra.mxu0 %v5205_v26  ;;  %4584 = vmatprep.subr.mxu1 %v4770_v1 }
 0x100   : > { %4551 = vmatprep.subr.mxu0 %v4770_v1  ;;  %4585 = vmatpush3.msra.mxu1 %v3235_v31 }
 0x101   : > { %4552 = vmatpush3.msra.mxu0 %v5214_v10  ;;  %4586 = vmatprep.subr.mxu1 %v4770_v1 }
 0x102   : > { %4553 = vmatprep.mubr.msk.f32.mxu0 %vm4771_vm0, %v4770_v1  ;;  %4563 = vmatprep.subr.mxu0 %v4770_v1 }
 0x103   : > { %4587 = vmatpush3.msra.mxu1 %v3242_v44  ;;  %4588 = vmatprep.mubr.msk.f32.mxu1 %vm4771_vm0, %v4770_v1 }
 0x104   : > { %4554 = vmatmul.mubr.f32.vlgmr.msra.gmra.mxu0 %v2731_v42  ;;  %4589 = vmatmul.mubr.f32.vlgmr.msra.gmra.mxu1 %v5314_v54 }
 0x105   : > { %4564 = vmatpush3.msra.mxu0 %v2771_v16  ;;  %4598 = vmatprep.subr.mxu1 %v4770_v1 }
 0x106   : > { %4565 = vmatprep.subr.mxu0 %v4770_v1  ;;  %4599 = vmatpush3.msra.mxu1 %v5253_v36 }
 0x107   : > { %4566 = vmatpush3.msra.mxu0 %v2778_v27  ;;  %4600 = vmatprep.subr.mxu1 %v4770_v1 }
 0x108   : > { %4567 = vmatprep.mubr.msk.f32.mxu0 %vm4771_vm0, %v4770_v1  ;;  %4577 = vmatprep.subr.mxu0 %v4770_v1 }
 0x109   : > { %4601 = vmatpush3.msra.mxu1 %v5261_v35  ;;  %4602 = vmatprep.mubr.msk.f32.mxu1 %vm4771_vm0, %v4770_v1 }
 0x10a   : > { %4568 = vmatmul.mubr.f32.vlgmr.msra.gmra.mxu0 %v5250_v34  ;;  %4603 = vmatmul.mubr.f32.vlgmr.msra.gmra.mxu1 %v3194_v57 }
 0x10b   : > { %4578 = vmatpush3.msra.mxu0 %v5253_v36  ;;  %4612 = vmatprep.subr.mxu1 %v4770_v1 }
 0x10c   : > { %4579 = vmatprep.subr.mxu0 %v4770_v1  ;;  %4613 = vmatpush3.msra.mxu1 %v5253_v36 }
 0x10d   : > { %4580 = vmatpush3.msra.mxu0 %v5261_v35  ;;  %4614 = vmatprep.subr.mxu1 %v4770_v1 }
 0x10e   : > { %4581 = vmatprep.mubr.msk.f32.mxu0 %vm4771_vm0, %v4770_v1  ;;  %4591 = vmatprep.subr.mxu0 %v4770_v1 }
 0x10f   : > { %4615 = vmatpush3.msra.mxu1 %v5261_v35  ;;  %4616 = vmatprep.mubr.msk.f32.mxu1 %vm4771_vm0, %v4770_v1 }
 0x110   : > { %4582 = vmatmul.mubr.f32.vlgmr.msra.gmra.mxu0 %v3196_v63  ;;  %4617 = vmatmul.mubr.f32.vlgmr.msra.gmra.mxu1 %v5314_v54 }
 0x111   : > { %4592 = vmatpush3.msra.mxu0 %v5269_v43  ;;  %4626 = vmatprep.subr.mxu1 %v4770_v1 }
 0x112   : > { %4593 = vmatprep.subr.mxu0 %v4770_v1  ;;  %4627 = vmatpush3.msra.mxu1 %v3697_v0 }
 0x113   : > { %4594 = vmatpush3.msra.mxu0 %v5278_v22  ;;  %4628 = vmatprep.subr.mxu1 %v4770_v1 }
 0x114   : > { %4595 = vmatprep.mubr.msk.f32.mxu0 %vm4771_vm0, %v4770_v1  ;;  %4605 = vmatprep.subr.mxu0 %v4770_v1 }
 0x115   : > { %4629 = vmatpush3.msra.mxu1 %v3704_v3  ;;  %4630 = vmatprep.mubr.msk.f32.mxu1 %vm4771_vm0, %v4770_v1 }
 0x116   : > { %4596 = vmatmul.mubr.f32.vlgmr.msra.gmra.mxu0 %v3193_v53  ;;  %4631 = vmatmul.mubr.f32.vlgmr.msra.gmra.mxu1 %v3654_v2 }
 0x117   : > { %4606 = vmatpush3.msra.mxu0 %v3233_v46  ;;  %4640 = vmatprep.subr.mxu1 %v4770_v1 }
 0x118   : > { %4607 = vmatprep.subr.mxu0 %v4770_v1  ;;  %4641 = vmatpush3.msra.mxu1 %v5317_v41 }
 0x119   : > { %4608 = vmatpush3.msra.mxu0 %v3240_v47  ;;  %4642 = vmatprep.subr.mxu1 %v4770_v1 }
 0x11a   : > { %4609 = vmatprep.mubr.msk.f32.mxu0 %vm4771_vm0, %v4770_v1  ;;  %4619 = vmatprep.subr.mxu0 %v4770_v1 }
 0x11b   : > { %4643 = vmatpush3.msra.mxu1 %v5325_v52  ;;  %4644 = vmatprep.mubr.msk.f32.mxu1 %vm4771_vm0, %v4770_v1 }
 0x11c   : > { %4610 = vmatmul.mubr.f32.vlgmr.msra.gmra.mxu0 %v5314_v54  ;;  %4645 = vmatmul.mubr.f32.vlgmr.msra.gmra.mxu1 %v3656_v38 }
 0x11d   : > { %4620 = vmatpush3.msra.mxu0 %v5317_v41  ;;  %4654 = vmatprep.subr.mxu1 %v4770_v1 }
 0x11e   : > { %4621 = vmatprep.subr.mxu0 %v4770_v1  ;;  %4655 = vmatpush3.msra.mxu1 %v5317_v41 }
 0x11f   : > { %4622 = vmatpush3.msra.mxu0 %v5325_v52  ;;  %4656 = vmatprep.subr.mxu1 %v4770_v1 }
 0x120   : > { %4623 = vmatprep.mubr.msk.f32.mxu0 %vm4771_vm0, %v4770_v1  ;;  %4633 = vmatprep.subr.mxu0 %v4770_v1 }
 0x121   : > { %4657 = vmatpush3.msra.mxu1 %v5325_v52  ;;  %4658 = vmatprep.mubr.msk.f32.mxu1 %vm4771_vm0, %v4770_v1 }
 0x122   : > { %4624 = vmatmul.mubr.f32.vlgmr.msra.gmra.mxu0 %v3658_v6  ;;  %4659 = vmatmul.mubr.f32.vlgmr.msra.gmra.mxu1 %v3654_v2 }
 0x123   : > { %4634 = vmatpush3.msra.mxu0 %v5333_v56  ;;  %4637 = vmatprep.mubr.msk.f32.mxu0 %vm4771_vm0, %v4770_v1 }
 0x124   : > { %4635 = vmatprep.subr.mxu0 %v4770_v1 }
 0x125   : > { %4636 = vmatpush3.msra.mxu0 %v5342_v29 }
 0x126   : > { %4647 = vmatprep.subr.mxu0 %v4770_v1  ;;  %4638 = vmatmul.mubr.f32.vlgmr.msra.gmra.mxu0 %v3655_v4 }
 0x127   : > { %4648 = vmatpush3.msra.mxu0 %v3695_v58  ;;  %4651 = vmatprep.mubr.msk.f32.mxu0 %vm4771_vm0, %v4770_v1 }
 0x128   : > { %4649 = vmatprep.subr.mxu0 %v4770_v1 }
 0x129   : > { %4650 = vmatpush3.msra.mxu0 %v3702_v59 }
 0x12a   : > { %4652 = vmatmul.mubr.f32.vlgmr.msra.gmra.mxu0 %v3654_v2 }
 0x15c   : > { %v507_v7 = vpop.f32.mrf.mxu1 }
 0x15e   : > { %v4338_v8 = vpop.f32.mrf.mxu1 }
 0x160   : > { %v658_v9 = vpop.f32.mrf.mxu1 }
 0x162   : > { %v4352_v11 = vpop.f32.mrf.mxu1 }
 0x164   : > { %v426_v14 = vpop.f32.mrf.mxu0  ;;  %v808_v15 = vpop.f32.mrf.mxu1 }
 0x165   : > { %v508_v20 = vadd.f32 %v507_v7, %v426_v14 }
 0x166   : > { %v4331_v18 = vpop.f32.mrf.mxu0  ;;  %v4366_v19 = vpop.f32.mrf.mxu1 }
 0x16a   : > { %v583_v21 = vpop.f32.mrf.mxu0  ;;  %v969_v23 = vpop.f32.mrf.mxu1 }
 0x16b   : > { %v584_v24 = vadd.f32 %v583_v21, %v508_v20 }
 0x16c   : > { %v4345_v25 = vpop.f32.mrf.mxu0  ;;  %v4380_v1 = vpop.f32.mrf.mxu1 }
 0x16d   : > { %v659_v26 = vadd.f32 %v658_v9, %v584_v24 }
 0x170   : > { %v735_v10 = vpop.f32.mrf.mxu0  ;;  %v1120_v12 = vpop.f32.mrf.mxu1 }
 0x171   : > { %v736_v16 = vadd.f32 %v735_v10, %v659_v26 }
 0x172   : > { %v4359_v27 = vpop.f32.mrf.mxu0  ;;  %v4394_v28 = vpop.f32.mrf.mxu1 }
 0x173   : > { %v809_v13 = vadd.f32 %v808_v15, %v736_v16 }
 0x175   : > { %4046 = vst [vmem:[%s5432_s11] sm:$0xff] %v809_v13 }
 0x176   : > { %v888_v17 = vpop.f32.mrf.mxu0  ;;  %v1270_v30 = vpop.f32.mrf.mxu1 }
 0x177   : > { %v970_v34 = vadd.f32 %v969_v23, %v888_v17 }
 0x178   : > { %v4373_v32 = vpop.f32.mrf.mxu0  ;;  %v4408_v33 = vpop.f32.mrf.mxu1 }
 0x17c   : > { %v1045_v36 = vpop.f32.mrf.mxu0  ;;  %v1431_v39 = vpop.f32.mrf.mxu1 }
 0x17d   : > { %v1046_v40 = vadd.f32 %v1045_v36, %v970_v34 }
 0x17e   : > { %v4387_v35 = vpop.f32.mrf.mxu0  ;;  %v4422_v42 = vpop.f32.mrf.mxu1 }
 0x17f   : > { %v1121_v43 = vadd.f32 %v1120_v12, %v1046_v40 }
 0x182   : > { %v1197_v22 = vpop.f32.mrf.mxu0  ;;  %v1582_v45 = vpop.f32.mrf.mxu1 }
 0x183   : > { %v1198_v46 = vadd.f32 %v1197_v22, %v1121_v43 }
 0x184   : > { %v4401_v47 = vpop.f32.mrf.mxu0  ;;  %v4436_v37 = vpop.f32.mrf.mxu1 }
 0x185   : > { %v1271_v48 = vadd.f32 %v1270_v30, %v1198_v46 }
 0x187   : > { %4047 = vst [vmem:[%s5432_s11 + $0x8] sm:$0xff] %v1271_v48 }
 0x188   : > { %v1350_v50 = vpop.f32.mrf.mxu0  ;;  %v1732_v51 = vpop.f32.mrf.mxu1 }
 0x189   : > { %v1432_v54 = vadd.f32 %v1431_v39, %v1350_v50 }
 0x18a   : > { %v4415_v55 = vpop.f32.mrf.mxu0  ;;  %v4450_v31 = vpop.f32.mrf.mxu1 }
 0x18e   : > { %v1507_v41 = vpop.f32.mrf.mxu0  ;;  %v1893_v49 = vpop.f32.mrf.mxu1 }
 0x18f   : > { %v1508_v44 = vadd.f32 %v1507_v41, %v1432_v54 }
 0x190   : > { %v4429_v52 = vpop.f32.mrf.mxu0  ;;  %v4464_v53 = vpop.f32.mrf.mxu1 }
 0x191   : > { %v1583_v56 = vadd.f32 %v1582_v45, %v1508_v44 }
 0x194   : > { %v1659_v29 = vpop.f32.mrf.mxu0  ;;  %v2044_v57 = vpop.f32.mrf.mxu1 }
 0x195   : > { %v1660_v58 = vadd.f32 %v1659_v29, %v1583_v56 }
 0x196   : > { %v4443_v59 = vpop.f32.mrf.mxu0  ;;  %v4478_v60 = vpop.f32.mrf.mxu1 }
 0x197   : > { %v1733_v61 = vadd.f32 %v1732_v51, %v1660_v58 }
 0x199   : > { %4048 = vst [vmem:[%s5432_s11 + $0x10] sm:$0xff] %v1733_v61 }
 0x19a   : > { %v1812_v62 = vpop.f32.mrf.mxu0  ;;  %v2194_v63 = vpop.f32.mrf.mxu1 }
 0x19b   : > { %v1894_v3 = vadd.f32 %v1893_v49, %v1812_v62 }
 0x19c   : > { %v4457_v0 = vpop.f32.mrf.mxu0  ;;  %v4492_v2 = vpop.f32.mrf.mxu1 }
 0x1a0   : > { %v1969_v4 = vpop.f32.mrf.mxu0  ;;  %v2355_v38 = vpop.f32.mrf.mxu1 }
 0x1a1   : > { %v1970_v5 = vadd.f32 %v1969_v4, %v1894_v3 }
 0x1a2   : > { %v4471_v6 = vpop.f32.mrf.mxu0  ;;  %v4506_v7 = vpop.f32.mrf.mxu1 }
 0x1a3   : > { %v2045_v8 = vadd.f32 %v2044_v57, %v1970_v5 }
 0x1a6   : > { %v2121_v9 = vpop.f32.mrf.mxu0  ;;  %v2506_v11 = vpop.f32.mrf.mxu1 }
 0x1a7   : > { %v2122_v14 = vadd.f32 %v2121_v9, %v2045_v8 }
 0x1a8   : > { %v4485_v15 = vpop.f32.mrf.mxu0  ;;  %v4520_v18 = vpop.f32.mrf.mxu1 }
 0x1a9   : > { %v2195_v19 = vadd.f32 %v2194_v63, %v2122_v14 }
 0x1ab   : > { %4049 = vst [vmem:[%s5432_s11 + $0x18] sm:$0xff] %v2195_v19 }
 0x1ac   : > { %v2274_v20 = vpop.f32.mrf.mxu0  ;;  %v2656_v21 = vpop.f32.mrf.mxu1 }
 0x1ad   : > { %v2356_v25 = vadd.f32 %v2355_v38, %v2274_v20 }
 0x1ae   : > { %v4499_v23 = vpop.f32.mrf.mxu0  ;;  %v4534_v24 = vpop.f32.mrf.mxu1 }
 0x1b2   : > { %v2431_v1 = vpop.f32.mrf.mxu0  ;;  %v2817_v26 = vpop.f32.mrf.mxu1 }
 0x1b3   : > { %v2432_v10 = vadd.f32 %v2431_v1, %v2356_v25 }
 0x1b4   : > { %v4513_v12 = vpop.f32.mrf.mxu0  ;;  %v4548_v16 = vpop.f32.mrf.mxu1 }
 0x1b5   : > { %v2507_v27 = vadd.f32 %v2506_v11, %v2432_v10 }
 0x1b8   : > { %v2583_v28 = vpop.f32.mrf.mxu0  ;;  %v2968_v13 = vpop.f32.mrf.mxu1 }
 0x1b9   : > { %v2584_v17 = vadd.f32 %v2583_v28, %v2507_v27 }
 0x1ba   : > { %v4527_v30 = vpop.f32.mrf.mxu0  ;;  %v4562_v32 = vpop.f32.mrf.mxu1 }
 0x1bb   : > { %v2657_v33 = vadd.f32 %v2656_v21, %v2584_v17 }
 0x1bd   : > { %4050 = vst [vmem:[%s5432_s11 + $0x20] sm:$0xff] %v2657_v33 }
 0x1be   : > { %v2736_v34 = vpop.f32.mrf.mxu0  ;;  %v3118_v36 = vpop.f32.mrf.mxu1 }
 0x1bf   : > { %v2818_v35 = vadd.f32 %v2817_v26, %v2736_v34 }
 0x1c0   : > { %v4541_v39 = vpop.f32.mrf.mxu0  ;;  %v4576_v40 = vpop.f32.mrf.mxu1 }
 0x1c4   : > { %v2893_v42 = vpop.f32.mrf.mxu0  ;;  %v3279_v43 = vpop.f32.mrf.mxu1 }
 0x1c5   : > { %v2894_v22 = vadd.f32 %v2893_v42, %v2818_v35 }
 0x1c6   : > { %v4555_v45 = vpop.f32.mrf.mxu0  ;;  %v4590_v46 = vpop.f32.mrf.mxu1 }
 0x1c7   : > { %v2969_v47 = vadd.f32 %v2968_v13, %v2894_v22 }
 0x1ca   : > { %v3045_v37 = vpop.f32.mrf.mxu0  ;;  %v3430_v48 = vpop.f32.mrf.mxu1 }
 0x1cb   : > { %v3046_v50 = vadd.f32 %v3045_v37, %v2969_v47 }
 0x1cc   : > { %v4569_v51 = vpop.f32.mrf.mxu0  ;;  %v4604_v55 = vpop.f32.mrf.mxu1 }
 0x1cd   : > { %v3119_v31 = vadd.f32 %v3118_v36, %v3046_v50 }
 0x1cf   : > { %4051 = vst [vmem:[%s5432_s11 + $0x28] sm:$0xff] %v3119_v31 }
 0x1d0   : > { %v3198_v54 = vpop.f32.mrf.mxu0  ;;  %v3580_v41 = vpop.f32.mrf.mxu1 }
 0x1d1   : > { %v3280_v52 = vadd.f32 %v3279_v43, %v3198_v54 }
 0x1d2   : > { %v4583_v49 = vpop.f32.mrf.mxu0  ;;  %v4618_v44 = vpop.f32.mrf.mxu1 }
 0x1d6   : > { %v3355_v53 = vpop.f32.mrf.mxu0  ;;  %v3741_v56 = vpop.f32.mrf.mxu1 }
 0x1d7   : > { %v3356_v29 = vadd.f32 %v3355_v53, %v3280_v52 }
 0x1d8   : > { %v4597_v57 = vpop.f32.mrf.mxu0  ;;  %v4632_v58 = vpop.f32.mrf.mxu1 }
 0x1d9   : > { %v3431_v59 = vadd.f32 %v3430_v48, %v3356_v29 }
 0x1dc   : > { %v3507_v60 = vpop.f32.mrf.mxu0  ;;  %v3892_v61 = vpop.f32.mrf.mxu1 }
 0x1dd   : > { %v3508_v62 = vadd.f32 %v3507_v60, %v3431_v59 }
 0x1de   : > { %v4611_v63 = vpop.f32.mrf.mxu0  ;;  %v4646_v0 = vpop.f32.mrf.mxu1 }
 0x1df   : > { %v3581_v2 = vadd.f32 %v3580_v41, %v3508_v62 }
 0x1e1   : > { %4052 = vst [vmem:[%s5432_s11 + $0x30] sm:$0xff] %v3581_v2 }
 0x1e2   : > { %v3660_v3 = vpop.f32.mrf.mxu0  ;;  %v4042_v4 = vpop.f32.mrf.mxu1 }
 0x1e3   : > { %v3742_v6 = vadd.f32 %v3741_v56, %v3660_v3 }
 0x1e4   : > { %v4625_v38 = vpop.f32.mrf.mxu0  ;;  %v4660_v5 = vpop.f32.mrf.mxu1 }
 0x1e6   : > { %v3817_v7 = vpop.f32.mrf.mxu0 }
 0x1e7   : > { %v3818_v8 = vadd.f32 %v3817_v7, %v3742_v6 }
 0x1e8   : > { %v4639_v9 = vpop.f32.mrf.mxu0 }
 0x1e9   : > { %v3893_v11 = vadd.f32 %v3892_v61, %v3818_v8 }
 0x1ea   : > { %v3969_v14 = vpop.f32.mrf.mxu0 }
 0x1eb   : > { %v3970_v15 = vadd.f32 %v3969_v14, %v3893_v11 }
 0x1ec   : > { %v4653_v18 = vpop.f32.mrf.mxu0 }
 0x1ed   : > { %v4043_v19 = vadd.f32 %v4042_v4, %v3970_v15 }
 0x1ef   : > { %4053 = vst [vmem:[%s5432_s11 + $0x38] sm:$0xff] %v4043_v19 }
 0x1f0   : > { %4720 = shalt.err (!%p4717_p3)
}
 0x1f1   : > { %s4721_s30 = scalar_lea.hbm %s5446_s25, 1024  ;;  %s4725_s6 = scalar_lea.hbm %s5496_s3, 2048 }
 0x1f2   : > { %p4722_p4 = scmp.ne.s32.totalorder %s5446_s25, %s4721_s30  ;;  %p4726_p9 = scmp.lt.s32.totalorder %s5446_s25, %s5496_s3 }
 0x1f3   : > { %p4727_p10 = scmp.lt.s32.totalorder %s4725_s6, %s4721_s30 }
 0x1f4   : > { %p4723_p7 = pnand %p4722_p4, %p4833_p5 }
 0x1f5   : > { %p4728_p11 = por %p4727_p10, %p4726_p9 }
 0x1f6   : > { %p4724_p8 = pneg %p4723_p7 }
 0x1f8   : > { %p4729_p12 = pnand %p4728_p11, %p4724_p8 }
 0x1fa   : > { %4732 = shalt.err (!%p4729_p12)
}
 0x1fb   : > { %s4773_s9 = smov 128   ;;  %s4774_s10 = smov 8  }
 0x1fc   : > { %4661 = dma.vmem_to_hbm [thread:$0]  (%p4833_p5), %s5448_s19, 1024, %s5446_s25, %s5453_s26, %s4773_s9, %s4773_s9, %s4774_s10  }
 0x1fd PF: > { %p4667_p13 = scmp.ge.s32.totalorder %s4767_s15, 2  ;;  %s4083_s11 = sand.u32 1, %s4755_s12  }
 0x1fe   : > { %s4084_s17 = scalar_lea.sflag [#allocation3], %s4083_s11 }
 0x1ff   : > { %p4664_p0 = pnand %p4667_p13, %p4837_p6 }
 0x201   : > { %p4665_p1 = pneg %p4664_p0 }
 0x203   : > { %4750 = dma.done.wait (%p4665_p1), %s4084_s17, 1024  }
 0x204   : > { %4752 = vsyncadd (%p4665_p1), %s4084_s17, 4294966272  ;;  %p13_p2 = scmp.ge.s32.totalorder %s4820_s18, 4   ;;  %s5499_s12 = smov %s4759_s13 }
 0x205   : > { %s5500_s13 = smov %s4763_s14  ;;  %s5501_s14 = smov %s4831_s21 }
 0x206   : > { %s5502_s15 = smov %s4820_s18  ;;  %15 = sbr.rel (!%p13_p2) target bundleno = 3 (0x3), region = 73 }
 0x20b   :  { %4089 = vsyncpa [#allocation3], 1 }
 0x20c   :  { %4091 = vsyncpa [#allocation3 + $0x1], 1 }

</bundles_post_ra>
